<compile_context>
chip_gen: v6e
topology: v6e:2x2x1
jax: 0.10.0
libtpu: 0.0.40
codegen_flags: <defaults>
</compile_context>

<pallas_src>
import functools

import jax
import jax.numpy as jnp
from jax import lax
from jax.experimental import pallas as pl
from jax.experimental.pallas import tpu as pltpu

EPS = 1e-5  # nn.InstanceNorm1d default eps


def _conv_in_relu_kernel(x_ref, w_ref, o_ref, *, l_out, taps_in_kernel):
    """One (batch, C_out-tile) grid step; channels-first so lanes = L_out.

    x_ref: (C_in_p, L_out + 2)    single padded copy (stride == 1), or
           (3*C_in_p, L_out)      pre-gathered taps  (stride  > 1)
    w_ref: (tile_cout, 3*C_in_p)  conv weight, K flattened tap-major
    o_ref: (tile_cout, L_out)
    """
    if taps_in_kernel:
        # The three k=3 conv taps are shifted views of one padded block; build
        # the K-fused RHS in VMEM (no 3x HBM materialization in the wrapper).
        rhs = jnp.concatenate([x_ref[:, k:k + l_out] for k in range(3)], axis=0)
    else:
        rhs = x_ref[...]

    # Conv1d(k=3, no bias) as a single MXU contraction with K = 3*C_in_p.
    acc = jnp.dot(w_ref[...], rhs, preferred_element_type=jnp.float32)

    # InstanceNorm1d (affine=False, biased variance, eps inside rsqrt) over L,
    # per (batch, channel).  Exact: every block holds the full L axis.
    mean = jnp.mean(acc, axis=1, keepdims=True)
    centered = acc - mean                       # hoisted, reused for var and y
    var = jnp.mean(centered * centered, axis=1, keepdims=True)
    y = centered * lax.rsqrt(var + EPS)

    o_ref[...] = jnp.maximum(y, 0.0).astype(o_ref.dtype)   # ReLU


def conv_in_relu_1d(x, weight, *, stride=1, matmul_dtype=None, max_cout_tile=256):
    """Forward pass of ConvINRelu1D.

    x:            (N, C_in, L)      NCL, as in PyTorch
    weight:       (C_out, C_in, 3)  Conv1d weight (no bias)
    matmul_dtype: optional dtype for the MXU inputs (e.g. jnp.bfloat16 on
                  v6e/v7x).  Norm math always runs in float32.
    returns       (N, C_out, L_out), L_out = (L + 2 - 3)//stride + 1
    """
    n, c_in, length = x.shape
    c_out, c_in_w, ksz = weight.shape
    assert ksz == 3 and c_in_w == c_in
    l_out = (length + 2 - 3) // stride + 1

    mm_dtype = jnp.dtype(matmul_dtype) if matmul_dtype is not None else jnp.dtype(x.dtype)

    # Pad C_in up to a sublane-tile multiple so the in-kernel tap concat is
    # tile-aligned (8 for 32-bit, 16 for 16-bit).  Zero channels are a no-op.
    sub = 8 * max(1, 4 // mm_dtype.itemsize)
    c_in_p = -(-c_in // sub) * sub

    # Conv weight (C_out, C_in, 3) -> pad C_in -> (C_out, 3, C_in_p) -> (C_out, 3*C_in_p).
    # K is tap-major to match the in-kernel RHS stacking order.
    w_flat = jnp.pad(weight, ((0, 0), (0, c_in_p - c_in), (0, 0)))
    w_flat = jnp.transpose(w_flat, (0, 2, 1)).reshape(c_out, 3 * c_in_p).astype(mm_dtype)

    if stride == 1:
        # One fused pad (spatial halo + channel alignment); taps sliced in-kernel.
        x_in = jnp.pad(x, ((0, 0), (0, c_in_p - c_in), (1, 1))).astype(mm_dtype)
        taps_in_kernel = True
    else:
        # TODO(synk): stride > 1 pre-gathers the 3 decimated taps in the wrapper
        # (~3/stride x of x); in-kernel strided lane slicing would avoid the copy.
        x_pad = jnp.pad(x, ((0, 0), (0, c_in_p - c_in), (1, 1)))
        taps = [x_pad[:, :, k:k + stride * (l_out - 1) + 1:stride] for k in range(3)]
        x_in = jnp.concatenate(taps, axis=1).astype(mm_dtype)    # (N, 3*C_in_p, L_out)
        taps_in_kernel = False

    # C_out tiling: bounds the resident VMEM block and gives megacore a second
    # "parallel" axis.  Per-channel stats over L make C_out tiles independent.
    if c_out <= max_cout_tile:
        tile_c = c_out
    else:
        tile_c = max(16, (max_cout_tile // 16) * 16)
    n_ct = pl.cdiv(c_out, tile_c)

    kernel = functools.partial(_conv_in_relu_kernel, l_out=l_out,
                               taps_in_kernel=taps_in_kernel)

    # Grid order (N outer, C_out tiles inner): the large per-batch x block stays
    # resident across the inner axis; only the small weight tile re-streams.
    out = pl.pallas_call(
        kernel,
        out_shape=jax.ShapeDtypeStruct((n, c_out, l_out), x.dtype),
        grid_spec=pltpu.PrefetchScalarGridSpec(
            num_scalar_prefetch=0,
            grid=(n, n_ct),
            in_specs=[
                pl.BlockSpec((None,) + x_in.shape[1:], lambda b, j: (b, 0, 0)),
                pl.BlockSpec((tile_c, 3 * c_in_p), lambda b, j: (j, 0)),
            ],
            out_specs=pl.BlockSpec((None, tile_c, l_out), lambda b, j: (b, j, 0)),
        ),
        compiler_params=pltpu.CompilerParams(
            dimension_semantics=("parallel", "parallel")),
    )(x_in, w_flat)
    return out


def _reference(x, weight, *, stride=1):
    """Pure-JAX reference (conv + instance norm + relu) for validation."""
    y = lax.conv_general_dilated(
        x, weight, window_strides=(stride,), padding=((1, 1),),
        dimension_numbers=("NCH", "OIH", "NCH"))
    mean = jnp.mean(y, axis=2, keepdims=True)
    var = jnp.mean((y - mean) ** 2, axis=2, keepdims=True)
    y = (y - mean) * lax.rsqrt(var + EPS)
    return jnp.maximum(y, 0.0)


if __name__ == "__main__":
    # Small shapes consistent with the module: N=2, C_in=4, C_out=8, L=16.
    key = jax.random.PRNGKey(0)
    kx, kw = jax.random.split(key)
    N, C_IN, C_OUT, L = 2, 4, 8, 16

    x = jax.random.normal(kx, (N, C_IN, L), dtype=jnp.float32)
    # Deterministic Conv1d weight init (kaiming-uniform-like bound), no bias.
    fan_in = C_IN * 3
    bound = 1.0 / jnp.sqrt(fan_in)
    weight = jax.random.uniform(
        kw, (C_OUT, C_IN, 3), dtype=jnp.float32, minval=-bound, maxval=bound)

    for stride in (1, 2):
        fwd = jax.jit(functools.partial(conv_in_relu_1d, stride=stride))
        out = jax.block_until_ready(fwd(x, weight))
        ref = _reference(x, weight, stride=stride)
        l_out = (L + 2 - 3) // stride + 1
        assert out.shape == ref.shape == (N, C_OUT, l_out)
        assert jnp.allclose(out, ref, atol=1e-5, rtol=1e-5), f"mismatch vs reference (stride={stride})"

    print("KERNEL_OK")
</pallas_src>

<mosaic_0001>
module attributes {stable_mosaic.version = 11 : i64} {
  func.func @_conv_in_relu_kernel(%arg0: i32, %arg1: i32, %arg2: memref<1x8x18xf32, #tpu.memory_space<vmem>>, %arg3: memref<8x24xf32, #tpu.memory_space<vmem>>, %arg4: memref<1x8x16xf32, #tpu.memory_space<vmem>>) attributes {dimension_semantics = [#tpu.dimension_semantics<parallel>, #tpu.dimension_semantics<parallel>], iteration_bounds = array<i64: 2, 1>, scalar_prefetch = 0 : i64, scratch_operands = 0 : i64, tpu.core_type = #tpu.core_type<tc>, window_params = [{transform_indices = @transform_0, window_bounds = array<i64: 1, 8, 18>}, {transform_indices = @transform_1, window_bounds = array<i64: 8, 24>}, {transform_indices = @transform_2, window_bounds = array<i64: 1, 8, 16>}]} {
    %c0 = arith.constant 0 : index
    %c0_0 = arith.constant 0 : index
    %c0_1 = arith.constant 0 : index
    %0 = vector.load %arg2[%c0, %c0_0, %c0_1] : memref<1x8x18xf32, #tpu.memory_space<vmem>>, vector<1x8x16xf32>
    %1 = vector.shape_cast %0 : vector<1x8x16xf32> to vector<8x16xf32>
    %c0_2 = arith.constant 0 : index
    %c0_3 = arith.constant 0 : index
    %c1 = arith.constant 1 : index
    %2 = vector.load %arg2[%c0_2, %c0_3, %c1] : memref<1x8x18xf32, #tpu.memory_space<vmem>>, vector<1x8x16xf32>
    %3 = vector.shape_cast %2 : vector<1x8x16xf32> to vector<8x16xf32>
    %c0_4 = arith.constant 0 : index
    %c0_5 = arith.constant 0 : index
    %c2 = arith.constant 2 : index
    %4 = vector.load %arg2[%c0_4, %c0_5, %c2] : memref<1x8x18xf32, #tpu.memory_space<vmem>>, vector<1x8x16xf32>
    %5 = vector.shape_cast %4 : vector<1x8x16xf32> to vector<8x16xf32>
    %6 = tpu.concatenate %1, %3, %5 in 0 : vector<8x16xf32>, vector<8x16xf32>, vector<8x16xf32> -> vector<24x16xf32>
    %c0_6 = arith.constant 0 : index
    %c0_7 = arith.constant 0 : index
    %7 = vector.load %arg3[%c0_6, %c0_7] : memref<8x24xf32, #tpu.memory_space<vmem>>, vector<8x24xf32>
    %cst = arith.constant dense<0.000000e+00> : vector<8x16xf32>
    %8 = tpu.matmul %7, %6, %cst {dimension_numbers = #tpu.dot_dimension_numbers<[1], [0], [0], [1], [0, 0, 1, 1], [], []>} : vector<8x24xf32>, vector<24x16xf32>, vector<8x16xf32> -> vector<8x16xf32>
    %cst_8 = arith.constant dense<0.000000e+00> : vector<8xf32>
    %9 = vector.multi_reduction <add>, %8, %cst_8 [1] : vector<8x16xf32> to vector<8xf32>
    %10 = vector.shape_cast %9 : vector<8xf32> to vector<8x1xf32>
    %cst_9 = arith.constant 1.600000e+01 : f32
    %11 = vector.broadcast %cst_9 : f32 to vector<8x1xf32>
    %12 = arith.divf %10, %11 : vector<8x1xf32>
    %13 = vector.broadcast %12 : vector<8x1xf32> to vector<8x16xf32>
    %14 = arith.subf %8, %13 : vector<8x16xf32>
    %15 = arith.mulf %14, %14 : vector<8x16xf32>
    %cst_10 = arith.constant dense<0.000000e+00> : vector<8xf32>
    %16 = vector.multi_reduction <add>, %15, %cst_10 [1] : vector<8x16xf32> to vector<8xf32>
    %17 = vector.shape_cast %16 : vector<8xf32> to vector<8x1xf32>
    %cst_11 = arith.constant 1.600000e+01 : f32
    %18 = vector.broadcast %cst_11 : f32 to vector<8x1xf32>
    %19 = arith.divf %17, %18 : vector<8x1xf32>
    %cst_12 = arith.constant 9.99999974E-6 : f32
    %20 = vector.broadcast %cst_12 : f32 to vector<8x1xf32>
    %21 = arith.addf %19, %20 : vector<8x1xf32>
    %22 = math.rsqrt %21 : vector<8x1xf32>
    %23 = vector.broadcast %22 : vector<8x1xf32> to vector<8x16xf32>
    %24 = arith.mulf %14, %23 : vector<8x16xf32>
    %cst_13 = arith.constant 0.000000e+00 : f32
    %25 = vector.broadcast %cst_13 : f32 to vector<8x16xf32>
    %26 = arith.maximumf %24, %25 : vector<8x16xf32>
    %c0_14 = arith.constant 0 : index
    %c0_15 = arith.constant 0 : index
    %c0_16 = arith.constant 0 : index
    %27 = vector.load %arg4[%c0_14, %c0_15, %c0_16] : memref<1x8x16xf32, #tpu.memory_space<vmem>>, vector<1x8x16xf32>
    %28 = vector.shape_cast %27 : vector<1x8x16xf32> to vector<8x16xf32>
    %29 = vector.shape_cast %26 : vector<8x16xf32> to vector<1x8x16xf32>
    tpu.vector_store %arg4[%c0_14, %c0_15, %c0_16], %29 {strides = array<i32>} : memref<1x8x16xf32, #tpu.memory_space<vmem>>, vector<1x8x16xf32>,
    return
  }
  func.func @transform_0(%arg0: i32, %arg1: i32) -> (i32, i32, i32) {
    %c0_i32 = arith.constant 0 : i32
    %c0_i32_0 = arith.constant 0 : i32
    %c0_i32_1 = arith.constant 0 : i32
    return %arg0, %c0_i32, %c0_i32_0 : i32, i32, i32
  }
  func.func @transform_1(%arg0: i32, %arg1: i32) -> (i32, i32) {
    %c0_i32 = arith.constant 0 : i32
    %c0_i32_0 = arith.constant 0 : i32
    return %arg1, %c0_i32 : i32, i32
  }
  func.func @transform_2(%arg0: i32, %arg1: i32) -> (i32, i32, i32) {
    %c0_i32 = arith.constant 0 : i32
    %c0_i32_0 = arith.constant 0 : i32
    return %arg0, %arg1, %c0_i32 : i32, i32, i32
  }
}

</mosaic_0001>

<bundles_post_ra>
// kernel: conv_in_relu_1d.1
= control target key start
LH: loop header
LB: loop body
LE: loop exit
PB: predicated region body
PF: predicated region fallthrough
CT: control target
= control target key end

     0   :  { %7 = vsyncpa [#allocation3], 0  ;;  %s658_s0 = inlined_call_operand.vmem [shape: f32[2,8,18], index: 0, kind: input, shape index: {}]   ;;  %s659_s1 = inlined_call_operand.vmem [shape: f32[8,24], index: 1, kind: input, shape index: {}]   ;;  %s660_s2 = inlined_call_operand.hbm [shape: f32[2,8,16], index: 2, kind: output, shape index: {}]  }
   0x1   :  { %9 = vsyncpa [#allocation3 + $0x1], 0  ;;  %s553_s9 = smov 0   ;;  %s555_s10 = smov 0  }
   0x2   :  { %s557_s11 = smov 0   ;;  %s559_s12 = smov 0  }
   0x3   :  { %s561_s13 = smov 0   ;;  %s563_s14 = smov 0  }
   0x4 LB: > { %s368_s15 = sadd.s32 4294967295, %s531_s14   ;;  %s369_s16 = sadd.s32 4294967294, %s531_s14   ;;  %s531_s14 = sphi %s563_s14, %s15_s14   ;;  %s527_s13 = sphi %s561_s13, %s667_s13   ;;  %s523_s12 = sphi %s559_s12, %s666_s12   ;;  %s519_s11 = sphi %s557_s11, %s665_s11   ;;  %s515_s10 = sphi %s555_s10, %s664_s10   ;;  %s511_s9 = sphi %s553_s9, %s663_s9  }
   0x5   : > { %s27_s17 = sadd.s32 1, %s527_s13  ;;  %s88_s18 = sadd.s32 1, %s519_s11 }
   0x6   : > { %p29_p0 = scmp.ge.s32.totalorder %s27_s17, 2  ;;  %p98_p1 = scmp.ne.s32.totalorder %s519_s11, %s515_s10 }
   0x7   : > { %p99_p2 = scmp.eq.s32.totalorder %s368_s15, 1  ;;  %p104_p3 = scmp.ne.s32.totalorder %s515_s10, %s511_s9 }
   0x8   : > { %s669_s17 = smov (%p29_p0, %s27_s17), 0  ;;  %p105_p5 = scmp.eq.s32.totalorder %s369_s16, 1 }
   0x9   : > { %p593_p4 = por %p99_p2, %p98_p1  ;;  %s83_s20 = ssub.s32 %s527_s13, %s669_s17 }
   0xa   : > { %p373_p6 = scmp.ge.s32.totalorder %s531_s14, 1  ;;  %p86_p7 = scmp.eq.s32.totalorder %s83_s20, 0 }
   0xb   : > { %p600_p8 = por %p105_p5, %p104_p3  ;;  %p137_p9 = scmp.lt.s32.totalorder %s531_s14, 3 }
   0xc   : > { %s606_s22 = scalar_select %p86_p7, %s519_s11, %s88_s18  }
   0xd   : > { %p138_p10 = pnand %p373_p6, %p137_p9 }
   0xe   : > { %p162_p11 = scmp.lt.s32.totalorder (!%p138_p10), %s523_s12, 1  ;;  %s535_s28 = smov (!%p138_p10), 126  }
   0xf   : > { %141 = sbr.rel (%p138_p10) target bundleno = 659 (0x293), region = 28  ;;  %s536_s29 = smov (!%p138_p10), 127  }
  0x10   : > { %s159_s4 = sand.u32 (!%p138_p10), 1, %s515_s10   ;;  %s378_s6 = sshll.u32 (!%p138_p10), %s523_s12, 7 }
  0x11   : > { %s374_s5 = sshll.u32 (!%p138_p10), %s159_s4, 3  ;;  %s283_s18 = scalar_lea.hbm (!%p138_p10), %s660_s2, %s378_s6 }
  0x12   : > { %s161_s7 = scalar_lea.vmem (!%p138_p10), [#allocation2], %s374_s5  ;;  %s271_s20 = scalar_lea.sflag (!%p138_p10), [#allocation3], %s159_s4 }
  0x13   : > { %s285_s8 = sshll.u32 (!%p138_p10), %s161_s7, 4  ;;  %s286_s8 = int_to_ptr.vmem [resolvable:$true] %s285_s8 }
  0x14   : > { %v533_v0 = vmov 0.0   ;;  %vm534_vm0 = vmmov 0   ;;  %s163_s23 = scalar_select %p162_p11, %s523_s12, 1  ;;  %v178_v4 = vld [vmem:[%s659_s1] sm:$0xff]  ;;  %vm179_vm1 = vcmask 195584   ;;  %vm253_vm2 = vcmask 130048  }
  0x15   : > { %385 = vmatprep.subr.mxu0 %v533_v0  ;;  %391 = vmatprep.mubr.msk.f32.mxu0 %vm534_vm0, %v533_v0 }
  0x16   : > { %s375_s24 = sshll.u32 %s163_s23, 3  ;;  %s455_s23 = scalar_lea.vmem %s286_s8, 128 }
  0x17   : > { %s165_s27 = scalar_lea.vmem %s658_s0, %s375_s24  ;;  %p456_p12 = scmp.ne.s32.totalorder %s286_s8, %s455_s23 }
  0x18   : > { %v170_v1 = vld [vmem:[%s165_s27] sm:$0xff]  ;;  %s537_s24 = smov [#allocation2]  }
  0x19   : > { %175 = vrot.lane.b32.xlu0 %v170_v1, %s535_s28  ;;  %p457_p13 = pnand %p456_p12, %p593_p4  ;;  %s459_s25 = sshll.u32 %s537_s24, 4  ;;  %s460_s25 = int_to_ptr.vmem [resolvable:$false] %s459_s25 }
  0x1a   : > { %s461_s12 = scalar_lea.vmem %s460_s25, 256  ;;  %p462_p1 = scmp.lt.s32.totalorder %s286_s8, %s460_s25 }
  0x1b   : > { %p458_p0 = pneg %p457_p13  ;;  %p463_p2 = scmp.lt.s32.totalorder %s461_s12, %s455_s23 }
  0x1d   : > { %172 = vrot.lane.b32.xlu0 %v170_v1, %s536_s29  ;;  %p464_p3 = por %p463_p2, %p462_p1 }
  0x1f   : > { %p465_p5 = pnand %p464_p3, %p458_p0 }
  0x8b   : > { %v176_v2 = vpop.permute.xlu0 %175 }
  0x8c   : > { %386 = vmatpush3.msra.mxu0 %v176_v2 }
  0x8d   : > { %387 = vmatprep.subr.mxu0 %v533_v0 }
  0x8f   : > { %v173_v3 = vpop.permute.xlu0 %172 }
  0x90   : > { %388 = vmatpush3.msra.mxu0 %v173_v3 }
  0x91   : > { %389 = vmatprep.subr.mxu0 %v533_v0 }
  0x92   : > { %390 = vmatpush3.msra.mxu0 %v170_v1 }
  0x93   : > { %392 = vmatmul.mubr.msk.f32.vlgmr.msra.gmra.mxu0 %vm179_vm1, %v178_v4 }
 0x153   : > { %v249_v5 = vpop.f32.mrf.mxu0 }
 0x154   : > { %v254_v6 = vsel %vm253_vm2, %v249_v5, 0.0 }
 0x155   : > { %255 = vadd.xlane.f32.xlu1 %v254_v6  ;;  %v393_v7 = vpop.f32.mrf.mxu0 }
 0x1de   : > { %v256_v8 = vpop.xlane.xlu1 %255 }
 0x1df   : > { %v258_v9 = vmul.f32 0.0625, %v256_v8 }
 0x1e1   : > { %v259_v10 = vsub.f32 %v249_v5, %v258_v9 }
 0x1e3   : > { %v260_v11 = vmul.f32 %v259_v10, %v259_v10 }
 0x1e5   : > { %v261_v12 = vsel %vm253_vm2, %v260_v11, 0.0 }
 0x1e6   : > { %262 = vadd.xlane.f32.xlu1 %v261_v12 }
 0x26f   : > { %v263_v13 = vpop.xlane.xlu1 %262 }
 0x270   : > { %v264_v14 = vmul.f32 0.0625, %v263_v13 }
 0x272   : > { %v265_v15 = vadd.f32 1e-05, %v264_v14 }
 0x274   : > { %453 = vrsqrt.f32 %v265_v15 }
 0x281   : > { %v454_v16 = vpop.eup %453 }
 0x282   : > { %v267_v17 = vmul.f32 %v454_v16, %v259_v10 }
 0x284   : > { %v268_v18 = vmax.f32 %v267_v17, 0.0 }
 0x286   : > { %269 = vst.msk [vmem:[%s161_s7] sm:$0xff] %vm253_vm2, %v268_v18 }
 0x287   : > { %468 = shalt.err (!%p465_p5)
}
 0x288   : > { %s469_s26 = scalar_lea.hbm %s283_s18, 128  ;;  %s473_s29 = scalar_lea.hbm %s660_s2, 256 }
 0x289   : > { %p470_p6 = scmp.ne.s32.totalorder %s283_s18, %s469_s26  ;;  %p474_p10 = scmp.lt.s32.totalorder %s283_s18, %s660_s2 }
 0x28a   : > { %p475_p11 = scmp.lt.s32.totalorder %s473_s29, %s469_s26 }
 0x28b   : > { %p471_p7 = pnand %p470_p6, %p593_p4 }
 0x28c   : > { %p476_p12 = por %p475_p11, %p474_p10 }
 0x28d   : > { %p472_p9 = pneg %p471_p7 }
 0x28f   : > { %p477_p13 = pnand %p476_p12, %p472_p9 }
 0x291   : > { %480 = shalt.err (!%p477_p13)
}
 0x292   : > { %394 = dma.vmem_to_hbm [thread:$0]  (%p593_p4), %s286_s8, 128, %s283_s18, %s271_s20  }
 0x293 PF: > { %p400_p0 = scmp.ge.s32.totalorder %s531_s14, 2  ;;  %s297_s4 = sand.u32 1, %s511_s9  }
 0x294   : > { %s298_s5 = scalar_lea.sflag [#allocation3], %s297_s4 }
 0x295   : > { %p397_p1 = pnand %p400_p0, %p600_p8 }
 0x297   : > { %p398_p2 = pneg %p397_p1 }
 0x299   : > { %506 = dma.done.wait (%p398_p2), %s298_s5, 128  }
 0x29a   : > { %508 = vsyncadd (%p398_p2), %s298_s5, 4294967168  ;;  %s15_s14 = sadd.s32 1, %s531_s14   ;;  %s663_s9 = smov %s515_s10 }
 0x29b   : > { %p12_p3 = scmp.ge.s32.totalorder %s15_s14, 4   ;;  %s664_s10 = smov %s519_s11 }
 0x29c   : > { %s665_s11 = smov %s606_s22  ;;  %s666_s12 = smov %s527_s13 }
 0x29d   : > { %s667_s13 = smov %s669_s17  ;;  %14 = sbr.rel (!%p12_p3) target bundleno = 4 (0x4), region = 66 }
 0x2a2   :  { %303 = vsyncpa [#allocation3], 1 }
 0x2a3   :  { %305 = vsyncpa [#allocation3 + $0x1], 1 }

</bundles_post_ra>
